<compile_context>
chip_gen: v5e
topology: v5e:2x2
jax: 0.10.0
libtpu: 0.0.40
codegen_flags: <defaults>
</compile_context>

<pallas_src>
import jax
import jax.numpy as jnp
from jax.experimental import pallas as pl
from jax.experimental.pallas import tpu as pltpu

_VIEW_SHAPE = (32, 1020, 59)
_VIEW_ELEMS = 32 * 1020 * 59          # 1_925_760 elements per output "batch"
_LANE = 128                           # 1_925_760 % 128 == 0 -> always factors
assert _VIEW_ELEMS % _LANE == 0

_MAX_DMA_CHUNKS = 4                   # concurrent HBM->HBM DMAs in the copy kernel


def _round_up(n, m):
    return ((n + m - 1) // m) * m


def _row_chunks(rows, max_chunks):
    """Split `rows` into <= max_chunks contiguous chunks, 8-aligned starts."""
    base = _round_up(-(-rows // max_chunks), 8)
    chunks = []
    start = 0
    while start < rows:
        size = min(base, rows - start)
        chunks.append((start, size))
        start += size
    return tuple(chunks)


def _make_hbm_copy_kernel(chunks):
    """Kernel: issue all chunked HBM->HBM DMAs, then wait for all of them."""

    def kernel(x_hbm, o_hbm, sems):
        copies = []
        for c, (start, size) in enumerate(chunks):  # static Python unroll
            cp = pltpu.make_async_copy(
                x_hbm.at[pl.ds(start, size), :],
                o_hbm.at[pl.ds(start, size), :],
                sems.at[c],
            )
            cp.start()
            copies.append(cp)
        for cp in copies:
            cp.wait()

    return kernel


def reshape_module_forward(x, *, materialize=False):
    """Pallas equivalent of `x.view(-1, 32, 1020, 59)`.

    materialize=False (default): metadata-only reshape, zero HBM traffic.
    materialize=True: produce a physically distinct output buffer via a direct
                      HBM->HBM DMA copy kernel (2 * total bytes of HBM traffic).
    """
    total = x.size
    if total % _VIEW_ELEMS != 0:
        raise ValueError(
            f"Input with {total} elements cannot be viewed as (-1, 32, 1020, 59)")
    batch = total // _VIEW_ELEMS
    out_shape = (batch,) + _VIEW_SHAPE

    if not materialize:
        # Highest-value path per the perf review: a contiguous view is free.
        return jnp.reshape(x, out_shape)

    itemsize = jnp.dtype(x.dtype).itemsize
    rows = total // _LANE
    chunks = _row_chunks(rows, _MAX_DMA_CHUNKS)

    # Lane-dense flat view of the contiguous row-major data. Under jit this
    # lowers to a bitcast; it feeds the kernel an untouched HBM ref.
    x_flat = x.reshape(rows, _LANE)

    out_flat = pl.pallas_call(
        _make_hbm_copy_kernel(chunks),
        out_shape=jax.ShapeDtypeStruct((rows, _LANE), x.dtype),
        in_specs=[pl.BlockSpec(memory_space=pl.ANY)],    # raw HBM ref, no auto-DMA
        out_specs=pl.BlockSpec(memory_space=pl.ANY),     # raw HBM ref, no auto-DMA
        scratch_shapes=[pltpu.SemaphoreType.DMA((len(chunks),))],
        cost_estimate=pl.CostEstimate(
            flops=0,
            transcendentals=0,
            bytes_accessed=2 * total * itemsize,
        ),
    )(x_flat)

    # Metadata-only glue back to the module's output shape.
    return out_flat.reshape(out_shape)


if __name__ == "__main__":
    key = jax.random.PRNGKey(0)
    # Smallest shapes consistent with the module: 2 * (32*1020*59) elements,
    # provided in a different contiguous shape so the view actually reshapes.
    x = jax.random.normal(key, (2, 1020, 32, 59), dtype=jnp.float32)
    ref = x.reshape(-1, 32, 1020, 59)

    # Default (recommended) path: metadata-only reshape, no kernel.
    out_view = jax.block_until_ready(reshape_module_forward(x))
    assert out_view.shape == (2, 32, 1020, 59), out_view.shape
    assert bool(jnp.array_equal(out_view, ref))

    # Materialized path: Pallas HBM->HBM DMA copy kernel.
    out_copy = jax.block_until_ready(reshape_module_forward(x, materialize=True))
    assert out_copy.shape == (2, 32, 1020, 59), out_copy.shape
    assert out_copy.dtype == x.dtype
    assert bool(jnp.array_equal(out_copy, ref))

    # Ragged-tail coverage (batch=1 -> rows=15045, final chunk not 8-sized).
    x1 = jax.random.normal(jax.random.PRNGKey(1), (1020, 32, 59), dtype=jnp.float32)
    out1 = jax.block_until_ready(reshape_module_forward(x1, materialize=True))
    assert out1.shape == (1, 32, 1020, 59), out1.shape
    assert bool(jnp.array_equal(out1, x1.reshape(-1, 32, 1020, 59)))

    print("KERNEL_OK")
</pallas_src>

<mosaic_0001>
module attributes {stable_mosaic.version = 11 : i64} {
  func.func @kernel(%arg0: memref<30090x128xf32, #tpu.memory_space<any>>, %arg1: memref<30090x128xf32, #tpu.memory_space<any>>, %arg2: memref<4x!tpu.dma_semaphore, #tpu.memory_space<semaphore_mem>>) attributes {dimension_semantics = [], scalar_prefetch = 0 : i64, scratch_operands = 1 : i64, tpu.core_type = #tpu.core_type<tc>} {
    %c0_i32 = arith.constant 0 : i32
    %c0_i32_0 = arith.constant 0 : i32
    %c0_i32_1 = arith.constant 0 : i32
    %0 = tpu.memref_slice %arg0[%c0_i32_0, %c0_i32_1] : memref<30090x128xf32, #tpu.memory_space<any>> -> memref<7528x128xf32, #tpu.memory_space<any>>
    %c0_i32_2 = arith.constant 0 : i32
    %c0_i32_3 = arith.constant 0 : i32
    %1 = tpu.memref_slice %arg1[%c0_i32_2, %c0_i32_3] : memref<30090x128xf32, #tpu.memory_space<any>> -> memref<7528x128xf32, #tpu.memory_space<any>>
    %2 = tpu.memref_slice %arg2[%c0_i32] : memref<4x!tpu.dma_semaphore, #tpu.memory_space<semaphore_mem>> -> memref<1x!tpu.dma_semaphore, #tpu.memory_space<semaphore_mem>>
    %3 = tpu.memref_squeeze %2 : memref<1x!tpu.dma_semaphore, #tpu.memory_space<semaphore_mem>> -> memref<!tpu.dma_semaphore, #tpu.memory_space<semaphore_mem>>
    tpu.enqueue_dma source(%0 : memref<7528x128xf32, #tpu.memory_space<any>>) target(%1 : memref<7528x128xf32, #tpu.memory_space<any>>) target_semaphore(%3 : memref<!tpu.dma_semaphore, #tpu.memory_space<semaphore_mem>>)
    %c1_i32 = arith.constant 1 : i32
    %c7528_i32 = arith.constant 7528 : i32
    %c0_i32_4 = arith.constant 0 : i32
    %4 = tpu.memref_slice %arg0[%c7528_i32, %c0_i32_4] : memref<30090x128xf32, #tpu.memory_space<any>> -> memref<7528x128xf32, #tpu.memory_space<any>>
    %c7528_i32_5 = arith.constant 7528 : i32
    %c0_i32_6 = arith.constant 0 : i32
    %5 = tpu.memref_slice %arg1[%c7528_i32_5, %c0_i32_6] : memref<30090x128xf32, #tpu.memory_space<any>> -> memref<7528x128xf32, #tpu.memory_space<any>>
    %6 = tpu.memref_slice %arg2[%c1_i32] : memref<4x!tpu.dma_semaphore, #tpu.memory_space<semaphore_mem>> -> memref<1x!tpu.dma_semaphore, #tpu.memory_space<semaphore_mem>>
    %7 = tpu.memref_squeeze %6 : memref<1x!tpu.dma_semaphore, #tpu.memory_space<semaphore_mem>> -> memref<!tpu.dma_semaphore, #tpu.memory_space<semaphore_mem>>
    tpu.enqueue_dma source(%4 : memref<7528x128xf32, #tpu.memory_space<any>>) target(%5 : memref<7528x128xf32, #tpu.memory_space<any>>) target_semaphore(%7 : memref<!tpu.dma_semaphore, #tpu.memory_space<semaphore_mem>>)
    %c2_i32 = arith.constant 2 : i32
    %c15056_i32 = arith.constant 15056 : i32
    %c0_i32_7 = arith.constant 0 : i32
    %8 = tpu.memref_slice %arg0[%c15056_i32, %c0_i32_7] : memref<30090x128xf32, #tpu.memory_space<any>> -> memref<7528x128xf32, #tpu.memory_space<any>>
    %c15056_i32_8 = arith.constant 15056 : i32
    %c0_i32_9 = arith.constant 0 : i32
    %9 = tpu.memref_slice %arg1[%c15056_i32_8, %c0_i32_9] : memref<30090x128xf32, #tpu.memory_space<any>> -> memref<7528x128xf32, #tpu.memory_space<any>>
    %10 = tpu.memref_slice %arg2[%c2_i32] : memref<4x!tpu.dma_semaphore, #tpu.memory_space<semaphore_mem>> -> memref<1x!tpu.dma_semaphore, #tpu.memory_space<semaphore_mem>>
    %11 = tpu.memref_squeeze %10 : memref<1x!tpu.dma_semaphore, #tpu.memory_space<semaphore_mem>> -> memref<!tpu.dma_semaphore, #tpu.memory_space<semaphore_mem>>
    tpu.enqueue_dma source(%8 : memref<7528x128xf32, #tpu.memory_space<any>>) target(%9 : memref<7528x128xf32, #tpu.memory_space<any>>) target_semaphore(%11 : memref<!tpu.dma_semaphore, #tpu.memory_space<semaphore_mem>>)
    %c3_i32 = arith.constant 3 : i32
    %c22584_i32 = arith.constant 22584 : i32
    %c0_i32_10 = arith.constant 0 : i32
    %12 = tpu.memref_slice %arg0[%c22584_i32, %c0_i32_10] : memref<30090x128xf32, #tpu.memory_space<any>> -> memref<7506x128xf32, #tpu.memory_space<any>>
    %c22584_i32_11 = arith.constant 22584 : i32
    %c0_i32_12 = arith.constant 0 : i32
    %13 = tpu.memref_slice %arg1[%c22584_i32_11, %c0_i32_12] : memref<30090x128xf32, #tpu.memory_space<any>> -> memref<7506x128xf32, #tpu.memory_space<any>>
    %14 = tpu.memref_slice %arg2[%c3_i32] : memref<4x!tpu.dma_semaphore, #tpu.memory_space<semaphore_mem>> -> memref<1x!tpu.dma_semaphore, #tpu.memory_space<semaphore_mem>>
    %15 = tpu.memref_squeeze %14 : memref<1x!tpu.dma_semaphore, #tpu.memory_space<semaphore_mem>> -> memref<!tpu.dma_semaphore, #tpu.memory_space<semaphore_mem>>
    tpu.enqueue_dma source(%12 : memref<7506x128xf32, #tpu.memory_space<any>>) target(%13 : memref<7506x128xf32, #tpu.memory_space<any>>) target_semaphore(%15 : memref<!tpu.dma_semaphore, #tpu.memory_space<semaphore_mem>>)
    %c0_i32_13 = arith.constant 0 : i32
    %c0_i32_14 = arith.constant 0 : i32
    %c0_i32_15 = arith.constant 0 : i32
    %16 = tpu.memref_slice %arg0[%c0_i32_14, %c0_i32_15] : memref<30090x128xf32, #tpu.memory_space<any>> -> memref<7528x128xf32, #tpu.memory_space<any>>
    %c0_i32_16 = arith.constant 0 : i32
    %c0_i32_17 = arith.constant 0 : i32
    %17 = tpu.memref_slice %arg1[%c0_i32_16, %c0_i32_17] : memref<30090x128xf32, #tpu.memory_space<any>> -> memref<7528x128xf32, #tpu.memory_space<any>>
    %18 = tpu.memref_slice %arg2[%c0_i32_13] : memref<4x!tpu.dma_semaphore, #tpu.memory_space<semaphore_mem>> -> memref<1x!tpu.dma_semaphore, #tpu.memory_space<semaphore_mem>>
    %19 = tpu.memref_squeeze %18 : memref<1x!tpu.dma_semaphore, #tpu.memory_space<semaphore_mem>> -> memref<!tpu.dma_semaphore, #tpu.memory_space<semaphore_mem>>
    tpu.wait_dma2 semaphore(%19 : memref<!tpu.dma_semaphore, #tpu.memory_space<semaphore_mem>>) src(%16 : memref<7528x128xf32, #tpu.memory_space<any>>) dst(%17 : memref<7528x128xf32, #tpu.memory_space<any>>)
    %c1_i32_18 = arith.constant 1 : i32
    %c7528_i32_19 = arith.constant 7528 : i32
    %c0_i32_20 = arith.constant 0 : i32
    %20 = tpu.memref_slice %arg0[%c7528_i32_19, %c0_i32_20] : memref<30090x128xf32, #tpu.memory_space<any>> -> memref<7528x128xf32, #tpu.memory_space<any>>
    %c7528_i32_21 = arith.constant 7528 : i32
    %c0_i32_22 = arith.constant 0 : i32
    %21 = tpu.memref_slice %arg1[%c7528_i32_21, %c0_i32_22] : memref<30090x128xf32, #tpu.memory_space<any>> -> memref<7528x128xf32, #tpu.memory_space<any>>
    %22 = tpu.memref_slice %arg2[%c1_i32_18] : memref<4x!tpu.dma_semaphore, #tpu.memory_space<semaphore_mem>> -> memref<1x!tpu.dma_semaphore, #tpu.memory_space<semaphore_mem>>
    %23 = tpu.memref_squeeze %22 : memref<1x!tpu.dma_semaphore, #tpu.memory_space<semaphore_mem>> -> memref<!tpu.dma_semaphore, #tpu.memory_space<semaphore_mem>>
    tpu.wait_dma2 semaphore(%23 : memref<!tpu.dma_semaphore, #tpu.memory_space<semaphore_mem>>) src(%20 : memref<7528x128xf32, #tpu.memory_space<any>>) dst(%21 : memref<7528x128xf32, #tpu.memory_space<any>>)
    %c2_i32_23 = arith.constant 2 : i32
    %c15056_i32_24 = arith.constant 15056 : i32
    %c0_i32_25 = arith.constant 0 : i32
    %24 = tpu.memref_slice %arg0[%c15056_i32_24, %c0_i32_25] : memref<30090x128xf32, #tpu.memory_space<any>> -> memref<7528x128xf32, #tpu.memory_space<any>>
    %c15056_i32_26 = arith.constant 15056 : i32
    %c0_i32_27 = arith.constant 0 : i32
    %25 = tpu.memref_slice %arg1[%c15056_i32_26, %c0_i32_27] : memref<30090x128xf32, #tpu.memory_space<any>> -> memref<7528x128xf32, #tpu.memory_space<any>>
    %26 = tpu.memref_slice %arg2[%c2_i32_23] : memref<4x!tpu.dma_semaphore, #tpu.memory_space<semaphore_mem>> -> memref<1x!tpu.dma_semaphore, #tpu.memory_space<semaphore_mem>>
    %27 = tpu.memref_squeeze %26 : memref<1x!tpu.dma_semaphore, #tpu.memory_space<semaphore_mem>> -> memref<!tpu.dma_semaphore, #tpu.memory_space<semaphore_mem>>
    tpu.wait_dma2 semaphore(%27 : memref<!tpu.dma_semaphore, #tpu.memory_space<semaphore_mem>>) src(%24 : memref<7528x128xf32, #tpu.memory_space<any>>) dst(%25 : memref<7528x128xf32, #tpu.memory_space<any>>)
    %c3_i32_28 = arith.constant 3 : i32
    %c22584_i32_29 = arith.constant 22584 : i32
    %c0_i32_30 = arith.constant 0 : i32
    %28 = tpu.memref_slice %arg0[%c22584_i32_29, %c0_i32_30] : memref<30090x128xf32, #tpu.memory_space<any>> -> memref<7506x128xf32, #tpu.memory_space<any>>
    %c22584_i32_31 = arith.constant 22584 : i32
    %c0_i32_32 = arith.constant 0 : i32
    %29 = tpu.memref_slice %arg1[%c22584_i32_31, %c0_i32_32] : memref<30090x128xf32, #tpu.memory_space<any>> -> memref<7506x128xf32, #tpu.memory_space<any>>
    %30 = tpu.memref_slice %arg2[%c3_i32_28] : memref<4x!tpu.dma_semaphore, #tpu.memory_space<semaphore_mem>> -> memref<1x!tpu.dma_semaphore, #tpu.memory_space<semaphore_mem>>
    %31 = tpu.memref_squeeze %30 : memref<1x!tpu.dma_semaphore, #tpu.memory_space<semaphore_mem>> -> memref<!tpu.dma_semaphore, #tpu.memory_space<semaphore_mem>>
    tpu.wait_dma2 semaphore(%31 : memref<!tpu.dma_semaphore, #tpu.memory_space<semaphore_mem>>) src(%28 : memref<7506x128xf32, #tpu.memory_space<any>>) dst(%29 : memref<7506x128xf32, #tpu.memory_space<any>>)
    return
  }
}

</mosaic_0001>

<bundles_post_ra>
// kernel: tpu_custom_call.1
= control target key start
LH: loop header
LB: loop body
LE: loop exit
PB: predicated region body
PF: predicated region fallthrough
CT: control target
= control target key end

     0   :  { %s117_s15 = smov [#allocation2]   ;;  %s118_s16 = smov [#allocation3]   ;;  %s164_s0 = inlined_call_operand.hbm [shape: f32[30090,128], index: 0, kind: input, shape index: {}]   ;;  %s165_s1 = inlined_call_operand.hbm [shape: f32[30090,128], index: 1, kind: output, shape index: {}]  }
   0x1   :  { %s10_s8 = sshll.u32 %s164_s0, 4  ;;  %s12_s11 = sshll.u32 %s165_s1, 4  ;;  %s11_s8 = int_to_ptr.hbm [resolvable:$true] %s10_s8  ;;  %s13_s11 = int_to_ptr.hbm [resolvable:$true] %s12_s11 }
   0x2   :  { %s17_s14 = scalar_lea.hbm %s164_s0, 7528  ;;  %s119_s17 = smov 0  }
   0x3   :  { %16 = dma.general %s11_s8, 120448, %s13_s11, %s117_s15, %s118_s16, [#allocation4], %s119_s17, 0  }
   0x4   :  { %s18_s20 = scalar_lea.hbm %s165_s1, 7528  ;;  %s24_s21 = sshll.u32 %s17_s14, 4  ;;  %s25_s21 = int_to_ptr.hbm [resolvable:$true] %s24_s21 }
   0x5   :  { %s26_s22 = sshll.u32 %s18_s20, 4  ;;  %s31_s25 = scalar_lea.hbm %s164_s0, 15056  ;;  %s27_s22 = int_to_ptr.hbm [resolvable:$true] %s26_s22 }
   0x6   :  { %s120_s26 = smov [#allocation2 + $0x1]   ;;  %s121_s27 = smov [#allocation5]  }
   0x7   :  { %30 = dma.general %s25_s21, 120448, %s27_s22, %s120_s26, %s121_s27, [#allocation6], %s119_s17, 0  }
   0x8   :  { %s32_s30 = scalar_lea.hbm %s165_s1, 15056  ;;  %s38_s2 = sshll.u32 %s31_s25, 4  ;;  %s39_s2 = int_to_ptr.hbm [resolvable:$true] %s38_s2 }
   0x9   :  { %s40_s3 = sshll.u32 %s32_s30, 4  ;;  %s45_s6 = scalar_lea.hbm %s164_s0, 22584  ;;  %s41_s3 = int_to_ptr.hbm [resolvable:$true] %s40_s3 }
   0xa   :  { %s122_s7 = smov [#allocation2 + $0x2]   ;;  %s123_s8 = smov [#allocation7]  }
   0xb   :  { %44 = dma.general %s39_s2, 120448, %s41_s3, %s122_s7, %s123_s8, [#allocation8], %s119_s17, 0  }
   0xc   :  { %s46_s11 = scalar_lea.hbm %s165_s1, 22584  ;;  %s52_s12 = sshll.u32 %s45_s6, 4  ;;  %s53_s12 = int_to_ptr.hbm [resolvable:$true] %s52_s12 }
   0xd   :  { %s54_s13 = sshll.u32 %s46_s11, 4  ;;  %s124_s14 = smov [#allocation2 + $0x3]   ;;  %s55_s13 = int_to_ptr.hbm [resolvable:$true] %s54_s13 }
   0xe   :  { %s125_s15 = smov [#allocation9]  }
   0xf   :  { %58 = dma.general %s53_s12, 120096, %s55_s13, %s124_s14, %s125_s15, [#allocation10], %s119_s17, 0  }
  0x10   :  { %109 = dma.done.wait [#allocation2], 120448 }
  0x11   :  { %110 = vsyncadd [#allocation2], 4294846848 }
  0x12   :  { %111 = dma.done.wait [#allocation2 + $0x1], 120448 }
  0x13   :  { %112 = vsyncadd [#allocation2 + $0x1], 4294846848 }
  0x14   :  { %113 = dma.done.wait [#allocation2 + $0x2], 120448 }
  0x15   :  { %114 = vsyncadd [#allocation2 + $0x2], 4294846848 }
  0x16   :  { %115 = dma.done.wait [#allocation2 + $0x3], 120096 }
  0x17   :  { %116 = vsyncadd [#allocation2 + $0x3], 4294847200 }
  0x18   :  { %69 = vsyncmov [#allocation2] }
  0x1b   :  { %s70_s0 = vpop.sfrf %69 }
  0x1c   :  { %p96_p0 = scmp.ne.s32.totalorder %s70_s0, 0 }
  0x1e   :  { %74 = shalt.err (%p96_p0)  }
  0x1f   :  { %76 = vsyncmov [#allocation2 + $0x1] }
  0x22   :  { %s77_s1 = vpop.sfrf %76 }
  0x23   :  { %p97_p1 = scmp.ne.s32.totalorder %s77_s1, 0 }
  0x25   :  { %81 = shalt.err (%p97_p1)  }
  0x26   :  { %83 = vsyncmov [#allocation2 + $0x2] }
  0x29   :  { %s84_s16 = vpop.sfrf %83 }
  0x2a   :  { %p98_p2 = scmp.ne.s32.totalorder %s84_s16, 0 }
  0x2c   :  { %88 = shalt.err (%p98_p2)  }
  0x2d   :  { %90 = vsyncmov [#allocation2 + $0x3] }
  0x30   :  { %s91_s17 = vpop.sfrf %90 }
  0x31   :  { %p99_p3 = scmp.ne.s32.totalorder %s91_s17, 0 }
  0x33   :  { %95 = shalt.err (%p99_p3)  }

</bundles_post_ra>
